<compile_context>
chip_gen: v6e
topology: v6e:2x2x1
jax: 0.10.0
libtpu: 0.0.40
codegen_flags: <defaults>
</compile_context>

<pallas_src>
import jax
import jax.numpy as jnp
from jax import lax
from jax.experimental import pallas as pl
from jax.experimental.pallas import tpu as pltpu

# Fixed by the module's hard-coded `text.reshape(B, 8, 8, 48)`.
_TC, _TH, _TW = 8, 8, 48
_TD = _TH * _TW                 # 384


def _attn_block_kernel(lat_ref, txt_ref,
                       w_ti_ref,
                       wq_ref, bq_ref,
                       wkv_ref, bkv_ref,
                       wo_ref, bo_ref,
                       out_ref):
    """One grid step = BB batch elements, fully fused (no HBM round-trips).

    lat_ref : (BB*C, D2)     flattened latent rows for this block
    txt_ref : (BB*TC, TD)    flattened text rows for this block
    w_ti_ref: (C, TC)        1x1-conv weight (channel mix)
    wq_ref  : (D2, HP)       bq_ref : (1, HP)        HP = hidden padded to 128
    wkv_ref : (TD, 2*HP)     concatenated K|V projection (zero-padded columns)
    bkv_ref : (C, 2*HP)      conv bias folded through K|V + K|V biases
    wo_ref  : (HP, D2)       bo_ref : (1, D2)
    out_ref : (BB*C, D2)
    """
    C, TC = w_ti_ref.shape
    BB = lat_ref.shape[0] // C
    HP2 = wkv_ref.shape[1]
    HP = HP2 // 2

    # --- Q projection: one big MXU matmul over all BB*C rows (DEFAULT prec).
    q = jnp.dot(lat_ref[...], wq_ref[...],
                preferred_element_type=jnp.float32) + bq_ref[...]   # (BB*C, HP)
    q = q.reshape(BB, C, HP)

    # --- Fused K|V projection; the 1x1 conv is applied afterwards via
    #     associativity:  (w_ti @ txt + b_ti) @ [wk|wv] + [bk|bv]
    #                  ==  w_ti @ (txt @ [wk|wv]) + bkv_fused
    txt_kv = jnp.dot(txt_ref[...], wkv_ref[...],
                     preferred_element_type=jnp.float32)             # (BB*TC, 2HP)
    txt_kv = txt_kv.reshape(BB, TC, HP2)
    w_ti_b = jnp.broadcast_to(w_ti_ref[...], (BB, C, TC))
    kv = jnp.einsum('bct,bth->bch', w_ti_b, txt_kv,
                    preferred_element_type=jnp.float32) + bkv_ref[...]
    k = kv[:, :, :HP]                                                # (BB, C, HP)
    v = kv[:, :, HP:]                                                # (BB, C, HP)

    # --- Attention: per-element (C, C) scores, numerically stable softmax. --
    s = jnp.einsum('bqh,bkh->bqk', q, k,
                   preferred_element_type=jnp.float32)               # (BB, C, C)
    s = s - jnp.max(s, axis=-1, keepdims=True)
    e = jnp.exp(s)
    p = e * pl.reciprocal(jnp.sum(e, axis=-1, keepdims=True), approx=True)
    ctx = jnp.einsum('bqk,bkh->bqh', p, v,
                     preferred_element_type=jnp.float32)              # (BB, C, HP)

    # --- Output projection: one big matmul; lane-dense (256-wide) store. ----
    out = jnp.dot(ctx.reshape(BB * C, HP), wo_ref[...],
                  preferred_element_type=jnp.float32) + bo_ref[...]  # (BB*C, D2)
    out_ref[...] = out.astype(out_ref.dtype)


def _pick_batch_block(B, C, target_rows=256):
    """Batch elements per grid step: pack MXU rows, keep >= 2 grid steps."""
    cap = max(1, target_rows // max(C, 1))
    if B >= 2:
        cap = min(cap, (B + 1) // 2)          # >= 2 steps -> both TCs on v7x
    for bb in range(min(cap, B), 0, -1):
        if B % bb == 0 and (bb * C) % 8 == 0 and (bb * _TC) % 8 == 0:
            return bb
    return B                                   # fallback: one full-size step


def prepare_params(params, lane=128):
    """One-time (init-side) conversion of PyTorch-convention params into the
    kernel layout: transposed, hidden dim zero-padded to a full lane group,
    K|V fused, and the 1x1-conv bias folded through the K|V projection.
    Not on the forward path, so no per-call transpose/pad dispatch cost."""
    C, TC = params["w_ti"].shape[:2]
    H, D2 = params["wq"].shape
    HP = -(-H // lane) * lane

    def pad_cols(w, n):
        return jnp.pad(w, ((0, 0), (0, n - w.shape[1])))

    w_ti = params["w_ti"].reshape(C, TC).astype(jnp.float32)
    b_ti = params["b_ti"].reshape(C).astype(jnp.float32)

    wq_t = pad_cols(jnp.transpose(params["wq"]), HP)                  # (D2, HP)
    bq = pad_cols(params["bq"].reshape(1, H), HP)                     # (1, HP)

    wk_t = pad_cols(jnp.transpose(params["wk"]), HP)                  # (TD, HP)
    wv_t = pad_cols(jnp.transpose(params["wv"]), HP)                  # (TD, HP)
    wkv_t = jnp.concatenate([wk_t, wv_t], axis=1)                     # (TD, 2HP)
    bkv = jnp.concatenate([pad_cols(params["bk"].reshape(1, H), HP),
                           pad_cols(params["bv"].reshape(1, H), HP)], axis=1)
    # (tfeat + b_ti) @ wkv  ==  tfeat @ wkv + b_ti[:, None] * colsum(wkv)
    bkv_fused = b_ti[:, None] * jnp.sum(wkv_t, axis=0)[None, :] + bkv  # (C, 2HP)

    wo_t = jnp.pad(jnp.transpose(params["wo"]), ((0, HP - H), (0, 0)))  # (HP, D2)
    bo = params["bo"].reshape(1, D2)

    return dict(w_ti=w_ti, wq_t=wq_t, bq=bq, wkv_t=wkv_t, bkv=bkv_fused,
                wo_t=wo_t, bo=bo)


def attn_block(latent, text, kparams, *, batch_block=None):
    """Pallas AttnBlock forward.

    latent : (B, C, L, L); text : (B, 8*8*48); kparams from prepare_params().
    """
    B, C, L, _ = latent.shape
    D2 = L * L

    BB = batch_block if batch_block is not None else _pick_batch_block(B, C)
    assert B % BB == 0, (B, BB)

    # Forward path does only free row-major reshapes (no transposes / pads).
    lat2 = latent.reshape(B * C, D2)
    txt2 = text.reshape(B * _TC, _TD)     # reshape(B,8,8,48) + flatten, merged

    w_ti, wq_t, bq = kparams["w_ti"], kparams["wq_t"], kparams["bq"]
    wkv_t, bkv = kparams["wkv_t"], kparams["bkv"]
    wo_t, bo = kparams["wo_t"], kparams["bo"]

    const = lambda i: (0, 0)   # weights: same block every step -> stay resident

    out = pl.pallas_call(
        _attn_block_kernel,
        out_shape=jax.ShapeDtypeStruct((B * C, D2), latent.dtype),
        grid=(B // BB,),
        in_specs=[
            pl.BlockSpec((BB * C, D2), lambda i: (i, 0)),
            pl.BlockSpec((BB * _TC, _TD), lambda i: (i, 0)),
            pl.BlockSpec(w_ti.shape, const),
            pl.BlockSpec(wq_t.shape, const),
            pl.BlockSpec(bq.shape, const),
            pl.BlockSpec(wkv_t.shape, const),
            pl.BlockSpec(bkv.shape, const),
            pl.BlockSpec(wo_t.shape, const),
            pl.BlockSpec(bo.shape, const),
        ],
        out_specs=pl.BlockSpec((BB * C, D2), lambda i: (i, 0)),
        compiler_params=pltpu.CompilerParams(
            dimension_semantics=("parallel",)),
    )(lat2, txt2, w_ti, wq_t, bq, wkv_t, bkv, wo_t, bo)

    return out.reshape(B, C, L, L)


def make_params(key, latent_channel, latent_dim, hidden_dim,
                text_channel, text_dim):
    """Parameters in PyTorch convention: Linear weight is (out, in)."""
    D2 = latent_dim * latent_dim
    ks = jax.random.split(key, 10)

    def lin(kw, kb, fan_in, fan_out):
        bound = 1.0 / (fan_in ** 0.5)
        w = jax.random.uniform(kw, (fan_out, fan_in), jnp.float32, -bound, bound)
        b = jax.random.uniform(kb, (fan_out,), jnp.float32, -bound, bound)
        return w, b

    w_ti, b_ti = lin(ks[0], ks[1], text_channel, latent_channel)
    wq, bq = lin(ks[2], ks[3], D2, hidden_dim)
    wk, bk = lin(ks[4], ks[5], text_dim, hidden_dim)
    wv, bv = lin(ks[6], ks[7], text_dim, hidden_dim)
    wo, bo = lin(ks[8], ks[9], hidden_dim, D2)
    return dict(
        w_ti=w_ti.reshape(latent_channel, text_channel, 1, 1), b_ti=b_ti,
        wq=wq, bq=bq, wk=wk, bk=bk, wv=wv, bv=bv, wo=wo, bo=bo)


def ref_attn_block(latent, text, params):
    """Plain-JAX reference mirroring the PyTorch forward (full f32 precision)."""
    HI = lax.Precision.HIGHEST
    B, C, L, _ = latent.shape
    D2 = L * L
    t = text.reshape(B, 8, 8, 48)                       # NCHW for the 1x1 conv
    y = lax.conv_general_dilated(
        t, params["w_ti"], (1, 1), "VALID",
        dimension_numbers=("NCHW", "OIHW", "NCHW"), precision=HI)
    y = y + params["b_ti"][None, :, None, None]
    tf = y.reshape(B, C, -1)                            # (B, C, 384)
    lat = latent.reshape(B, C, D2)

    q = jnp.einsum("bcd,hd->bch", lat, params["wq"], precision=HI) + params["bq"]
    k = jnp.einsum("bcd,hd->bch", tf, params["wk"], precision=HI) + params["bk"]
    v = jnp.einsum("bcd,hd->bch", tf, params["wv"], precision=HI) + params["bv"]

    w = jnp.einsum("bch,bkh->bck", q, k, precision=HI)
    w = jax.nn.softmax(w, axis=-1)
    o = jnp.einsum("bck,bkh->bch", w, v, precision=HI)
    o = jnp.einsum("bch,dh->bcd", o, params["wo"], precision=HI) + params["bo"]
    return o.reshape(B, C, L, L)


if __name__ == "__main__":
    key = jax.random.PRNGKey(0)
    kx, kt, kp = jax.random.split(key, 3)

    B = 8
    latent_channel, latent_dim, hidden_dim = 8, 16, 32
    text_channel, text_dim = _TC, _TD      # fixed by the hard-coded reshape(B,8,8,48)

    latent = jax.random.normal(
        kx, (B, latent_channel, latent_dim, latent_dim), jnp.float32)
    text = jax.random.normal(kt, (B, text_channel * text_dim), jnp.float32)

    params = make_params(kp, latent_channel, latent_dim, hidden_dim,
                         text_channel, text_dim)
    kparams = prepare_params(params)       # one-time, init-side weight prep

    out = jax.jit(attn_block)(latent, text, kparams)
    out = jax.block_until_ready(out)

    ref = jax.block_until_ready(ref_attn_block(latent, text, params))
    assert out.shape == (B, latent_channel, latent_dim, latent_dim), out.shape
    # Kernel matmuls run at DEFAULT precision (single bf16 MXU pass with f32
    # accumulation) and the softmax uses the approximate EUP reciprocal, so
    # compare against the full-f32 reference with a relaxed tolerance.
    assert jnp.allclose(out, ref, rtol=5e-2, atol=5e-2), \
        float(jnp.max(jnp.abs(out - ref)))

    print("KERNEL_OK")
</pallas_src>

<mosaic_0001>
module attributes {stable_mosaic.version = 11 : i64} {
  func.func @_attn_block_kernel(%arg0: i32, %arg1: memref<32x256xf32, #tpu.memory_space<vmem>>, %arg2: memref<32x384xf32, #tpu.memory_space<vmem>>, %arg3: memref<8x8xf32, #tpu.memory_space<vmem>>, %arg4: memref<256x128xf32, #tpu.memory_space<vmem>>, %arg5: memref<1x128xf32, #tpu.memory_space<vmem>>, %arg6: memref<384x256xf32, #tpu.memory_space<vmem>>, %arg7: memref<8x256xf32, #tpu.memory_space<vmem>>, %arg8: memref<128x256xf32, #tpu.memory_space<vmem>>, %arg9: memref<1x256xf32, #tpu.memory_space<vmem>>, %arg10: memref<32x256xf32, #tpu.memory_space<vmem>>) attributes {dimension_semantics = [#tpu.dimension_semantics<parallel>], iteration_bounds = array<i64: 2>, scalar_prefetch = 0 : i64, scratch_operands = 0 : i64, tpu.core_type = #tpu.core_type<tc>, window_params = [{transform_indices = @transform_0, window_bounds = array<i64: 32, 256>}, {transform_indices = @transform_1, window_bounds = array<i64: 32, 384>}, {pipeline_mode = #tpu.pipeline_mode<synchronous>, transform_indices = @transform_2, window_bounds = array<i64: 8, 8>}, {pipeline_mode = #tpu.pipeline_mode<synchronous>, transform_indices = @transform_3, window_bounds = array<i64: 256, 128>}, {pipeline_mode = #tpu.pipeline_mode<synchronous>, transform_indices = @transform_4, window_bounds = array<i64: 1, 128>}, {pipeline_mode = #tpu.pipeline_mode<synchronous>, transform_indices = @transform_5, window_bounds = array<i64: 384, 256>}, {pipeline_mode = #tpu.pipeline_mode<synchronous>, transform_indices = @transform_6, window_bounds = array<i64: 8, 256>}, {pipeline_mode = #tpu.pipeline_mode<synchronous>, transform_indices = @transform_7, window_bounds = array<i64: 128, 256>}, {pipeline_mode = #tpu.pipeline_mode<synchronous>, transform_indices = @transform_8, window_bounds = array<i64: 1, 256>}, {transform_indices = @transform_9, window_bounds = array<i64: 32, 256>}]} {
    %c0 = arith.constant 0 : index
    %c0_0 = arith.constant 0 : index
    %0 = vector.load %arg1[%c0, %c0_0] : memref<32x256xf32, #tpu.memory_space<vmem>>, vector<32x256xf32>
    %c0_1 = arith.constant 0 : index
    %c0_2 = arith.constant 0 : index
    %1 = vector.load %arg4[%c0_1, %c0_2] : memref<256x128xf32, #tpu.memory_space<vmem>>, vector<256x128xf32>
    %cst = arith.constant dense<0.000000e+00> : vector<32x128xf32>
    %2 = tpu.matmul %0, %1, %cst {dimension_numbers = #tpu.dot_dimension_numbers<[1], [0], [0], [1], [0, 0, 1, 1], [], []>} : vector<32x256xf32>, vector<256x128xf32>, vector<32x128xf32> -> vector<32x128xf32>
    %c0_3 = arith.constant 0 : index
    %c0_4 = arith.constant 0 : index
    %3 = vector.load %arg5[%c0_3, %c0_4] : memref<1x128xf32, #tpu.memory_space<vmem>>, vector<1x128xf32>
    %4 = vector.broadcast %3 : vector<1x128xf32> to vector<32x128xf32>
    %5 = arith.addf %2, %4 : vector<32x128xf32>
    %6 = vector.shape_cast %5 : vector<32x128xf32> to vector<4x8x128xf32>
    %c0_5 = arith.constant 0 : index
    %c0_6 = arith.constant 0 : index
    %7 = vector.load %arg2[%c0_5, %c0_6] : memref<32x384xf32, #tpu.memory_space<vmem>>, vector<32x384xf32>
    %c0_7 = arith.constant 0 : index
    %c0_8 = arith.constant 0 : index
    %8 = vector.load %arg6[%c0_7, %c0_8] : memref<384x256xf32, #tpu.memory_space<vmem>>, vector<384x256xf32>
    %cst_9 = arith.constant dense<0.000000e+00> : vector<32x256xf32>
    %9 = tpu.matmul %7, %8, %cst_9 {dimension_numbers = #tpu.dot_dimension_numbers<[1], [0], [0], [1], [0, 0, 1, 1], [], []>} : vector<32x384xf32>, vector<384x256xf32>, vector<32x256xf32> -> vector<32x256xf32>
    %10 = vector.shape_cast %9 : vector<32x256xf32> to vector<4x8x256xf32>
    %c0_10 = arith.constant 0 : index
    %c0_11 = arith.constant 0 : index
    %11 = vector.load %arg3[%c0_10, %c0_11] : memref<8x8xf32, #tpu.memory_space<vmem>>, vector<8x8xf32>
    %12 = vector.shape_cast %11 : vector<8x8xf32> to vector<1x8x8xf32>
    %13 = vector.broadcast %12 : vector<1x8x8xf32> to vector<4x8x8xf32>
    "tpu.trace_start"() <{level = 10 : i32, message = "bct,bth->bch"}> : () -> ()
    %cst_12 = arith.constant dense<0.000000e+00> : vector<4x8x256xf32>
    %14 = tpu.matmul %13, %10, %cst_12 {dimension_numbers = #tpu.dot_dimension_numbers<[2], [1], [1], [2], [0, 0, 0, 1, 1, 2], [0], [0]>} : vector<4x8x8xf32>, vector<4x8x256xf32>, vector<4x8x256xf32> -> vector<4x8x256xf32>
    "tpu.trace_stop"() : () -> ()
    %c0_13 = arith.constant 0 : index
    %c0_14 = arith.constant 0 : index
    %15 = vector.load %arg7[%c0_13, %c0_14] : memref<8x256xf32, #tpu.memory_space<vmem>>, vector<8x256xf32>
    %16 = vector.shape_cast %15 : vector<8x256xf32> to vector<1x8x256xf32>
    %17 = vector.broadcast %16 : vector<1x8x256xf32> to vector<4x8x256xf32>
    %18 = arith.addf %14, %17 : vector<4x8x256xf32>
    %19 = vector.extract_strided_slice %18 {offsets = [0, 0, 0], sizes = [4, 8, 128], strides = [1, 1, 1]} : vector<4x8x256xf32> to vector<4x8x128xf32>
    %20 = vector.extract_strided_slice %18 {offsets = [0, 0, 128], sizes = [4, 8, 128], strides = [1, 1, 1]} : vector<4x8x256xf32> to vector<4x8x128xf32>
    "tpu.trace_start"() <{level = 10 : i32, message = "bqh,bkh->bqk"}> : () -> ()
    %cst_15 = arith.constant dense<0.000000e+00> : vector<4x8x8xf32>
    %21 = tpu.matmul %6, %19, %cst_15 {dimension_numbers = #tpu.dot_dimension_numbers<[2], [2], [1], [1], [0, 0, 0, 1, 1, 1], [0], [0]>} : vector<4x8x128xf32>, vector<4x8x128xf32>, vector<4x8x8xf32> -> vector<4x8x8xf32>
    "tpu.trace_stop"() : () -> ()
    %cst_16 = arith.constant dense<0xFF800000> : vector<4x8xf32>
    %22 = vector.multi_reduction <maximumf>, %21, %cst_16 [2] : vector<4x8x8xf32> to vector<4x8xf32>
    %23 = vector.shape_cast %22 : vector<4x8xf32> to vector<4x8x1xf32>
    %24 = vector.broadcast %23 : vector<4x8x1xf32> to vector<4x8x8xf32>
    %25 = arith.subf %21, %24 : vector<4x8x8xf32>
    %26 = math.exp %25 : vector<4x8x8xf32>
    %cst_17 = arith.constant dense<0.000000e+00> : vector<4x8xf32>
    %27 = vector.multi_reduction <add>, %26, %cst_17 [2] : vector<4x8x8xf32> to vector<4x8xf32>
    %28 = vector.shape_cast %27 : vector<4x8xf32> to vector<4x8x1xf32>
    %29 = tpu.reciprocal %28 {approx = true} : vector<4x8x1xf32> -> vector<4x8x1xf32>
    %30 = vector.broadcast %29 : vector<4x8x1xf32> to vector<4x8x8xf32>
    %31 = arith.mulf %26, %30 : vector<4x8x8xf32>
    "tpu.trace_start"() <{level = 10 : i32, message = "bqk,bkh->bqh"}> : () -> ()
    %cst_18 = arith.constant dense<0.000000e+00> : vector<4x8x128xf32>
    %32 = tpu.matmul %31, %20, %cst_18 {dimension_numbers = #tpu.dot_dimension_numbers<[2], [1], [1], [2], [0, 0, 0, 1, 1, 2], [0], [0]>} : vector<4x8x8xf32>, vector<4x8x128xf32>, vector<4x8x128xf32> -> vector<4x8x128xf32>
    "tpu.trace_stop"() : () -> ()
    %33 = vector.shape_cast %32 : vector<4x8x128xf32> to vector<32x128xf32>
    %c0_19 = arith.constant 0 : index
    %c0_20 = arith.constant 0 : index
    %34 = vector.load %arg8[%c0_19, %c0_20] : memref<128x256xf32, #tpu.memory_space<vmem>>, vector<128x256xf32>
    %cst_21 = arith.constant dense<0.000000e+00> : vector<32x256xf32>
    %35 = tpu.matmul %33, %34, %cst_21 {dimension_numbers = #tpu.dot_dimension_numbers<[1], [0], [0], [1], [0, 0, 1, 1], [], []>} : vector<32x128xf32>, vector<128x256xf32>, vector<32x256xf32> -> vector<32x256xf32>
    %c0_22 = arith.constant 0 : index
    %c0_23 = arith.constant 0 : index
    %36 = vector.load %arg9[%c0_22, %c0_23] : memref<1x256xf32, #tpu.memory_space<vmem>>, vector<1x256xf32>
    %37 = vector.broadcast %36 : vector<1x256xf32> to vector<32x256xf32>
    %38 = arith.addf %35, %37 : vector<32x256xf32>
    %c0_24 = arith.constant 0 : index
    %c0_25 = arith.constant 0 : index
    %39 = vector.load %arg10[%c0_24, %c0_25] : memref<32x256xf32, #tpu.memory_space<vmem>>, vector<32x256xf32>
    tpu.vector_store %arg10[%c0_24, %c0_25], %38 {strides = array<i32>} : memref<32x256xf32, #tpu.memory_space<vmem>>, vector<32x256xf32>,
    return
  }
  func.func @transform_0(%arg0: i32) -> (i32, i32) {
    %c0_i32 = arith.constant 0 : i32
    %c0_i32_0 = arith.constant 0 : i32
    return %arg0, %c0_i32 : i32, i32
  }
  func.func @transform_1(%arg0: i32) -> (i32, i32) {
    %c0_i32 = arith.constant 0 : i32
    %c0_i32_0 = arith.constant 0 : i32
    return %arg0, %c0_i32 : i32, i32
  }
  func.func @transform_2(%arg0: i32) -> (i32, i32) {
    %c0_i32 = arith.constant 0 : i32
    %c0_i32_0 = arith.constant 0 : i32
    %c0_i32_1 = arith.constant 0 : i32
    return %c0_i32, %c0_i32_0 : i32, i32
  }
  func.func @transform_3(%arg0: i32) -> (i32, i32) {
    %c0_i32 = arith.constant 0 : i32
    %c0_i32_0 = arith.constant 0 : i32
    %c0_i32_1 = arith.constant 0 : i32
    return %c0_i32, %c0_i32_0 : i32, i32
  }
  func.func @transform_4(%arg0: i32) -> (i32, i32) {
    %c0_i32 = arith.constant 0 : i32
    %c0_i32_0 = arith.constant 0 : i32
    %c0_i32_1 = arith.constant 0 : i32
    return %c0_i32, %c0_i32_0 : i32, i32
  }
  func.func @transform_5(%arg0: i32) -> (i32, i32) {
    %c0_i32 = arith.constant 0 : i32
    %c0_i32_0 = arith.constant 0 : i32
    %c0_i32_1 = arith.constant 0 : i32
    return %c0_i32, %c0_i32_0 : i32, i32
  }
  func.func @transform_6(%arg0: i32) -> (i32, i32) {
    %c0_i32 = arith.constant 0 : i32
    %c0_i32_0 = arith.constant 0 : i32
    %c0_i32_1 = arith.constant 0 : i32
    return %c0_i32, %c0_i32_0 : i32, i32
  }
  func.func @transform_7(%arg0: i32) -> (i32, i32) {
    %c0_i32 = arith.constant 0 : i32
    %c0_i32_0 = arith.constant 0 : i32
    %c0_i32_1 = arith.constant 0 : i32
    return %c0_i32, %c0_i32_0 : i32, i32
  }
  func.func @transform_8(%arg0: i32) -> (i32, i32) {
    %c0_i32 = arith.constant 0 : i32
    %c0_i32_0 = arith.constant 0 : i32
    %c0_i32_1 = arith.constant 0 : i32
    return %c0_i32, %c0_i32_0 : i32, i32
  }
  func.func @transform_9(%arg0: i32) -> (i32, i32) {
    %c0_i32 = arith.constant 0 : i32
    %c0_i32_0 = arith.constant 0 : i32
    return %arg0, %c0_i32 : i32, i32
  }
}

</mosaic_0001>

<bundles_post_ra>
// kernel: attn_block.1
= control target key start
LH: loop header
LB: loop body
LE: loop exit
PB: predicated region body
PF: predicated region fallthrough
CT: control target
= control target key end

     0   :  { %s2115_s30 = smov 0   ;;  %s2732_s0 = inlined_call_operand.vmem [shape: f32[64,256], index: 0, kind: input, shape index: {}]   ;;  %s2733_s1 = inlined_call_operand.vmem [shape: f32[64,384], index: 1, kind: input, shape index: {}]   ;;  %s2734_s2 = inlined_call_operand.vmem [shape: f32[8,8], index: 2, kind: input, shape index: {}]   ;;  %s2735_s3 = inlined_call_operand.vmem [shape: f32[256,128], index: 3, kind: input, shape index: {}]   ;;  %s2736_s4 = inlined_call_operand.vmem [shape: f32[1,128], index: 4, kind: input, shape index: {}]   ;;  %s2737_s5 = inlined_call_operand.vmem [shape: f32[384,256], index: 5, kind: input, shape index: {}]   ;;  %s2738_s6 = inlined_call_operand.vmem [shape: f32[8,256], index: 6, kind: input, shape index: {}]   ;;  %s2739_s7 = inlined_call_operand.vmem [shape: f32[128,256], index: 7, kind: input, shape index: {}]   ;;  %s2740_s8 = inlined_call_operand.vmem [shape: f32[1,256], index: 8, kind: input, shape index: {}]   ;;  %s2741_s9 = inlined_call_operand.vmem [shape: f32[64,256], index: 9, kind: output, shape index: {}]  }
   0x1 LB: > { %s1902_s10 = sadd.s32 4294967295, %s2061_s30   ;;  %p1906_p0 = scmp.ge.s32.totalorder %s2061_s30, 1  ;;  %s2061_s30 = sphi %s2115_s30, %s19_s30  }
   0x2   : > { %p301_p1 = scmp.lt.s32.totalorder %s2061_s30, 3 }
   0x4   : > { %p302_p2 = pnand %p1906_p0, %p301_p1 }
   0x5   : > { %s1907_s17 = sshll.u32 (!%p302_p2), %s1902_s10, 2 }
   0x6   : > { %305 = sbr.rel (%p302_p2) target bundleno = 1413 (0x585), region = 56  ;;  %p346_p3 = scmp.lt.s32.totalorder (!%p302_p2), %s1907_s17, 7 }
   0xb   : > { %v405_v0 = vld [vmem:[%s2735_s3 + $0xf8] sm:$0xff]  ;;  %v404_v2 = vld [vmem:[%s2735_s3 + $0xf0] sm:$0xff]  ;;  %v2063_v4 = vmov 0.0   ;;  %v403_v5 = vld [vmem:[%s2735_s3 + $0xe8] sm:$0xff]  ;;  %s2743_s17 = smov (!%p346_p3, %s1907_s17), 7  ;;  %vm787_vm0 = vcmask 64512  }
   0xc   : > { %v389_v1 = vld [vmem:[%s2735_s3 + $0x78] sm:$0xff]  ;;  %1928 = vmatprep.subr.mxu1 %v405_v0  ;;  %v388_v3 = vld [vmem:[%s2735_s3 + $0x70] sm:$0xff]  ;;  %759 = vmatprep.mubr.f32.mxu0 %v2063_v4  ;;  %v387_v6 = vld [vmem:[%s2735_s3 + $0x68] sm:$0xff]  ;;  %s1926_s28 = sshll.u32 %s2743_s17, 4  ;;  %s2028_s21 = smul.u32 24, %s2743_s17  ;;  %vm2064_vm1 = vmmov 0  }
   0xd   : > { %1929 = vmatpush3.msra.mxu1 %v389_v1  ;;  %v402_v7 = vld [vmem:[%s2735_s3 + $0xe0] sm:$0xff]  ;;  %v401_v9 = vld [vmem:[%s2735_s3 + $0xd8] sm:$0xff]  ;;  %s2162_s15 = scalar_lea.vmem %s2732_s0, %s1926_s28  ;;  %v400_v11 = vld [vmem:[%s2735_s3 + $0xd0] sm:$0xff]  ;;  %s364_s23 = scalar_lea.vmem %s2741_s9, %s1926_s28 }
   0xe   : > { %1930 = vmatprep.subr.mxu1 %v404_v2  ;;  %v386_v8 = vld [vmem:[%s2735_s3 + $0x60] sm:$0xff]  ;;  %v385_v10 = vld [vmem:[%s2735_s3 + $0x58] sm:$0xff]  ;;  %v384_v12 = vld [vmem:[%s2735_s3 + $0x50] sm:$0xff]  ;;  %s2404_s19 = scalar_lea.vmem %s2733_s1, %s2028_s21 }
   0xf   : > { %1931 = vmatpush3.msra.mxu1 %v388_v3  ;;  %v399_v13 = vld [vmem:[%s2735_s3 + $0xc8] sm:$0xff]  ;;  %v398_v16 = vld [vmem:[%s2735_s3 + $0xc0] sm:$0xff]  ;;  %v397_v18 = vld [vmem:[%s2735_s3 + $0xb8] sm:$0xff] }
  0x10   : > { %1932 = vmatprep.subr.mxu1 %v403_v5  ;;  %v367_v14 = vld [vmem:[%s2162_s15 + $0x8] sm:$0xff]  ;;  %v382_v17 = vld [vmem:[%s2735_s3 + $0x40] sm:$0xff]  ;;  %v381_v19 = vld [vmem:[%s2735_s3 + $0x38] sm:$0xff] }
  0x11   : > { %1933 = vmatpush3.msra.mxu1 %v387_v6  ;;  %v383_v15 = vld [vmem:[%s2735_s3 + $0x48] sm:$0xff]  ;;  %477 = vmatprep.mubr.f32.mxu1 %v367_v14  ;;  %v396_v20 = vld [vmem:[%s2735_s3 + $0xb0] sm:$0xff]  ;;  %v394_v24 = vld [vmem:[%s2735_s3 + $0xa0] sm:$0xff] }
  0x12   : > { %1934 = vmatprep.subr.mxu1 %v402_v7  ;;  %v380_v21 = vld [vmem:[%s2735_s3 + $0x30] sm:$0xff]  ;;  %v395_v22 = vld [vmem:[%s2735_s3 + $0xa8] sm:$0xff]  ;;  %v378_v25 = vld [vmem:[%s2735_s3 + $0x20] sm:$0xff] }
  0x13   : > { %1935 = vmatpush3.msra.mxu1 %v386_v8  ;;  %v379_v23 = vld [vmem:[%s2735_s3 + $0x28] sm:$0xff]  ;;  %v605_v26 = vld [vmem:[%s2737_s5 + $0x2f8] sm:$0xff]  ;;  %v604_v28 = vld [vmem:[%s2737_s5 + $0x2f0] sm:$0xff] }
  0x14   : > { %1936 = vmatprep.subr.mxu1 %v401_v9  ;;  %v393_v27 = vld [vmem:[%s2735_s3 + $0x98] sm:$0xff]  ;;  %695 = vmatprep.subr.mxu0 %v605_v26  ;;  %v603_v30 = vld [vmem:[%s2737_s5 + $0x2e8] sm:$0xff]  ;;  %v602_v31 = vld [vmem:[%s2737_s5 + $0x2e0] sm:$0xff] }
  0x15   : > { %1937 = vmatpush3.msra.mxu1 %v385_v10  ;;  %v377_v29 = vld [vmem:[%s2735_s3 + $0x18] sm:$0xff]  ;;  %696 = vmatpush1.msra.mxu0 %v604_v28  ;;  %v392_v32 = vld [vmem:[%s2735_s3 + $0x90] sm:$0xff]  ;;  %v599_v36 = vld [vmem:[%s2737_s5 + $0x2c8] sm:$0xff] }
  0x16   : > { %1938 = vmatprep.subr.mxu1 %v400_v11  ;;  %697 = vmatprep.subr.mxu0 %v603_v30  ;;  %v601_v33 = vld [vmem:[%s2737_s5 + $0x2d8] sm:$0xff]  ;;  %v376_v34 = vld [vmem:[%s2735_s3 + $0x10] sm:$0xff]  ;;  %v391_v37 = vld [vmem:[%s2735_s3 + $0x88] sm:$0xff] }
  0x17   : > { %1939 = vmatpush3.msra.mxu1 %v384_v12  ;;  %698 = vmatpush1.msra.mxu0 %v602_v31  ;;  %v600_v35 = vld [vmem:[%s2737_s5 + $0x2d0] sm:$0xff]  ;;  %v598_v38 = vld [vmem:[%s2737_s5 + $0x2c0] sm:$0xff]  ;;  %v375_v39 = vld [vmem:[%s2735_s3 + $0x8] sm:$0xff] }
  0x18   : > { %1940 = vmatprep.subr.mxu1 %v399_v13  ;;  %699 = vmatprep.subr.mxu0 %v601_v33  ;;  %v597_v40 = vld [vmem:[%s2737_s5 + $0x2b8] sm:$0xff]  ;;  %v390_v41 = vld [vmem:[%s2735_s3 + $0x80] sm:$0xff]  ;;  %v596_v42 = vld [vmem:[%s2737_s5 + $0x2b0] sm:$0xff] }
  0x19   : > { %1941 = vmatpush3.msra.mxu1 %v383_v15  ;;  %700 = vmatpush1.msra.mxu0 %v600_v35  ;;  %v374_v43 = vld [vmem:[%s2735_s3] sm:$0xff]  ;;  %v595_v44 = vld [vmem:[%s2737_s5 + $0x2a8] sm:$0xff]  ;;  %v541_v46 = vld [vmem:[%s2737_s5 + $0xf8] sm:$0xff] }
  0x1a   : > { %1942 = vmatprep.subr.mxu1 %v398_v16  ;;  %701 = vmatprep.subr.mxu0 %v599_v36  ;;  %v366_v45 = vld [vmem:[%s2162_s15] sm:$0xff]  ;;  %v540_v47 = vld [vmem:[%s2737_s5 + $0xf0] sm:$0xff]  ;;  %v539_v49 = vld [vmem:[%s2737_s5 + $0xe8] sm:$0xff] }
  0x1b   : > { %1943 = vmatpush3.msra.mxu1 %v382_v17  ;;  %702 = vmatpush1.msra.mxu0 %v598_v38  ;;  %v594_v48 = vld [vmem:[%s2737_s5 + $0x2a0] sm:$0xff]  ;;  %v593_v50 = vld [vmem:[%s2737_s5 + $0x298] sm:$0xff]  ;;  %v592_v52 = vld [vmem:[%s2737_s5 + $0x290] sm:$0xff] }
  0x1c   : > { %1944 = vmatprep.subr.mxu1 %v397_v18  ;;  %703 = vmatprep.subr.mxu0 %v597_v40  ;;  %v538_v51 = vld [vmem:[%s2737_s5 + $0xe0] sm:$0xff]  ;;  %v537_v53 = vld [vmem:[%s2737_s5 + $0xd8] sm:$0xff]  ;;  %v591_v54 = vld [vmem:[%s2737_s5 + $0x288] sm:$0xff] }
  0x1d   : > { %1945 = vmatpush3.msra.mxu1 %v381_v19  ;;  %704 = vmatpush1.msra.mxu0 %v596_v42  ;;  %v536_v55 = vld [vmem:[%s2737_s5 + $0xd0] sm:$0xff]  ;;  %v590_v56 = vld [vmem:[%s2737_s5 + $0x280] sm:$0xff]  ;;  %v535_v57 = vld [vmem:[%s2737_s5 + $0xc8] sm:$0xff] }
  0x1e   : > { %1946 = vmatprep.subr.mxu1 %v396_v20  ;;  %705 = vmatprep.subr.mxu0 %v595_v44  ;;  %v589_v58 = vld [vmem:[%s2737_s5 + $0x278] sm:$0xff]  ;;  %v534_v59 = vld [vmem:[%s2737_s5 + $0xc0] sm:$0xff]  ;;  %v588_v60 = vld [vmem:[%s2737_s5 + $0x270] sm:$0xff] }
  0x1f   : > { %1947 = vmatpush3.msra.mxu1 %v380_v21  ;;  %706 = vmatpush1.msra.mxu0 %v594_v48  ;;  %v533_v61 = vld [vmem:[%s2737_s5 + $0xb8] sm:$0xff]  ;;  %v587_v62 = vld [vmem:[%s2737_s5 + $0x268] sm:$0xff]  ;;  %v532_v63 = vld [vmem:[%s2737_s5 + $0xb0] sm:$0xff] }
  0x20   : > { %1948 = vmatprep.subr.mxu1 %v395_v22  ;;  %707 = vmatprep.subr.mxu0 %v593_v50  ;;  %v369_v0 = vld [vmem:[%s2162_s15 + $0x18] sm:$0xff]  ;;  %v531_v1 = vld [vmem:[%s2737_s5 + $0xa8] sm:$0xff]  ;;  %v586_v2 = vld [vmem:[%s2737_s5 + $0x260] sm:$0xff] }
  0x21   : > { %1949 = vmatpush3.msra.mxu1 %v379_v23  ;;  %708 = vmatpush1.msra.mxu0 %v592_v52  ;;  %v530_v3 = vld [vmem:[%s2737_s5 + $0xa0] sm:$0xff]  ;;  %v585_v5 = vld [vmem:[%s2737_s5 + $0x258] sm:$0xff]  ;;  %v368_v7 = vld [vmem:[%s2162_s15 + $0x10] sm:$0xff] }
  0x22   : > { %1950 = vmatprep.subr.mxu1 %v394_v24  ;;  %709 = vmatprep.subr.mxu0 %v591_v54  ;;  %v529_v6 = vld [vmem:[%s2737_s5 + $0x98] sm:$0xff]  ;;  %v528_v8 = vld [vmem:[%s2737_s5 + $0x90] sm:$0xff]  ;;  %v527_v10 = vld [vmem:[%s2737_s5 + $0x88] sm:$0xff] }
  0x23   : > { %1951 = vmatpush3.msra.mxu1 %v378_v25  ;;  %710 = vmatpush1.msra.mxu0 %v590_v56  ;;  %v584_v9 = vld [vmem:[%s2737_s5 + $0x250] sm:$0xff]  ;;  %v583_v11 = vld [vmem:[%s2737_s5 + $0x248] sm:$0xff]  ;;  %v526_v12 = vld [vmem:[%s2737_s5 + $0x80] sm:$0xff] }
  0x24   : > { %1952 = vmatprep.subr.mxu1 %v393_v27  ;;  %711 = vmatprep.subr.mxu0 %v589_v58  ;;  %v371_v13 = vld [vmem:[%s2162_s15 + $0x28] sm:$0xff]  ;;  %v525_v14 = vld [vmem:[%s2737_s5 + $0x78] sm:$0xff]  ;;  %v582_v15 = vld [vmem:[%s2737_s5 + $0x240] sm:$0xff] }
  0x25   : > { %1953 = vmatpush3.msra.mxu1 %v377_v29  ;;  %712 = vmatpush1.msra.mxu0 %v588_v60  ;;  %v524_v16 = vld [vmem:[%s2737_s5 + $0x70] sm:$0xff]  ;;  %v581_v17 = vld [vmem:[%s2737_s5 + $0x238] sm:$0xff]  ;;  %v523_v18 = vld [vmem:[%s2737_s5 + $0x68] sm:$0xff] }
  0x26   : > { %1954 = vmatprep.subr.mxu1 %v392_v32  ;;  %713 = vmatprep.subr.mxu0 %v587_v62  ;;  %v370_v19 = vld [vmem:[%s2162_s15 + $0x20] sm:$0xff]  ;;  %v580_v21 = vld [vmem:[%s2737_s5 + $0x230] sm:$0xff]  ;;  %v521_v22 = vld [vmem:[%s2737_s5 + $0x58] sm:$0xff] }
  0x27   : > { %1955 = vmatpush3.msra.mxu1 %v376_v34  ;;  %714 = vmatpush1.msra.mxu0 %v586_v2  ;;  %v522_v20 = vld [vmem:[%s2737_s5 + $0x60] sm:$0xff]  ;;  %v579_v23 = vld [vmem:[%s2737_s5 + $0x228] sm:$0xff]  ;;  %v520_v24 = vld [vmem:[%s2737_s5 + $0x50] sm:$0xff] }
  0x28   : > { %1956 = vmatprep.subr.mxu1 %v391_v37  ;;  %715 = vmatprep.subr.mxu0 %v585_v5  ;;  %v373_v25 = vld [vmem:[%s2162_s15 + $0x38] sm:$0xff]  ;;  %v519_v26 = vld [vmem:[%s2737_s5 + $0x48] sm:$0xff]  ;;  %v578_v27 = vld [vmem:[%s2737_s5 + $0x220] sm:$0xff] }
  0x29   : > { %1957 = vmatpush3.msra.mxu1 %v375_v39  ;;  %716 = vmatpush1.msra.mxu0 %v584_v9  ;;  %v518_v28 = vld [vmem:[%s2737_s5 + $0x40] sm:$0xff]  ;;  %v577_v29 = vld [vmem:[%s2737_s5 + $0x218] sm:$0xff]  ;;  %v372_v31 = vld [vmem:[%s2162_s15 + $0x30] sm:$0xff] }
  0x2a   : > { %1958 = vmatprep.subr.mxu1 %v390_v41  ;;  %717 = vmatprep.subr.mxu0 %v583_v11  ;;  %v517_v30 = vld [vmem:[%s2737_s5 + $0x38] sm:$0xff]  ;;  %v516_v32 = vld [vmem:[%s2737_s5 + $0x30] sm:$0xff]  ;;  %v515_v34 = vld [vmem:[%s2737_s5 + $0x28] sm:$0xff] }
  0x2b   : > { %1959 = vmatpush3.msra.mxu1 %v374_v43  ;;  %718 = vmatpush1.msra.mxu0 %v582_v15  ;;  %v576_v33 = vld [vmem:[%s2737_s5 + $0x210] sm:$0xff]  ;;  %v575_v35 = vld [vmem:[%s2737_s5 + $0x208] sm:$0xff]  ;;  %v514_v36 = vld [vmem:[%s2737_s5 + $0x20] sm:$0xff] }
  0x2c   : > { %478 = vmatmul.mubr.f32.vlgmr.msra.gmra.mxu1 %v366_v45  ;;  %606 = vmatprep.subr.mxu1 %v541_v46  ;;  %v574_v37 = vld [vmem:[%s2737_s5 + $0x200] sm:$0xff]  ;;  %v513_v38 = vld [vmem:[%s2737_s5 + $0x18] sm:$0xff]  ;;  %v500_v39 = vld [vmem:[%s2404_s19 + $0x10] sm:$0xff] }
  0x2d   : > { %607 = vmatpush1.msra.mxu1 %v540_v47  ;;  %482 = vmatprep.mubr.f32.mxu1 %v369_v0  ;;  %v512_v40 = vld [vmem:[%s2737_s5 + $0x10] sm:$0xff]  ;;  %v499_v41 = vld [vmem:[%s2404_s19 + $0x8] sm:$0xff]  ;;  %v510_v43 = vld [vmem:[%s2737_s5] sm:$0xff] }
  0x2e   : > { %608 = vmatprep.subr.mxu1 %v539_v49  ;;  %719 = vmatprep.subr.mxu0 %v581_v17  ;;  %v511_v42 = vld [vmem:[%s2737_s5 + $0x8] sm:$0xff]  ;;  %v573_v44 = vld [vmem:[%s2737_s5 + $0x1f8] sm:$0xff]  ;;  %v572_v46 = vld [vmem:[%s2737_s5 + $0x1f0] sm:$0xff] }
  0x2f   : > { %609 = vmatpush1.msra.mxu1 %v538_v51  ;;  %720 = vmatpush1.msra.mxu0 %v580_v21  ;;  %v503_v45 = vld [vmem:[%s2404_s19 + $0x28] sm:$0xff]  ;;  %v570_v48 = vld [vmem:[%s2737_s5 + $0x1e0] sm:$0xff]  ;;  %v569_v49 = vld [vmem:[%s2737_s5 + $0x1d8] sm:$0xff] }
  0x30   : > { %610 = vmatprep.subr.mxu1 %v537_v53  ;;  %483 = vmatmul.mubr.f32.gmra.mxu1 %v368_v7  ;;  %v571_v47 = vld [vmem:[%s2737_s5 + $0x1e8] sm:$0xff]  ;;  %v506_v50 = vld [vmem:[%s2404_s19 + $0x40] sm:$0xff]  ;;  %v568_v51 = vld [vmem:[%s2737_s5 + $0x1d0] sm:$0xff] }
  0x31   : > { %611 = vmatpush1.msra.mxu1 %v536_v55  ;;  %487 = vmatprep.mubr.f32.mxu1 %v371_v13  ;;  %v567_v52 = vld [vmem:[%s2737_s5 + $0x1c8] sm:$0xff]  ;;  %v566_v53 = vld [vmem:[%s2737_s5 + $0x1c0] sm:$0xff]  ;;  %v565_v54 = vld [vmem:[%s2737_s5 + $0x1b8] sm:$0xff] }
  0x32   : > { %612 = vmatprep.subr.mxu1 %v535_v57  ;;  %721 = vmatprep.subr.mxu0 %v579_v23  ;;  %v509_v55 = vld [vmem:[%s2404_s19 + $0x58] sm:$0xff]  ;;  %v564_v56 = vld [vmem:[%s2737_s5 + $0x1b0] sm:$0xff]  ;;  %v563_v57 = vld [vmem:[%s2737_s5 + $0x1a8] sm:$0xff] }
  0x33   : > { %613 = vmatpush1.msra.mxu1 %v534_v59  ;;  %722 = vmatpush1.msra.mxu0 %v578_v27  ;;  %v562_v58 = vld [vmem:[%s2737_s5 + $0x1a0] sm:$0xff]  ;;  %v561_v59 = vld [vmem:[%s2737_s5 + $0x198] sm:$0xff]  ;;  %v560_v60 = vld [vmem:[%s2737_s5 + $0x190] sm:$0xff] }
  0x34   : > { %614 = vmatprep.subr.mxu1 %v533_v61  ;;  %488 = vmatmul.mubr.f32.gmra.mxu1 %v370_v19  ;;  %v559_v61 = vld [vmem:[%s2737_s5 + $0x188] sm:$0xff]  ;;  %v558_v62 = vld [vmem:[%s2737_s5 + $0x180] sm:$0xff]  ;;  %v556_v0 = vld [vmem:[%s2737_s5 + $0x170] sm:$0xff] }
  0x35   : > { %615 = vmatpush1.msra.mxu1 %v532_v63  ;;  %492 = vmatprep.mubr.f32.mxu1 %v373_v25  ;;  %v557_v63 = vld [vmem:[%s2737_s5 + $0x178] sm:$0xff]  ;;  %v554_v2 = vld [vmem:[%s2737_s5 + $0x160] sm:$0xff]  ;;  %v552_v5 = vld [vmem:[%s2737_s5 + $0x150] sm:$0xff] }
  0x36   : > { %616 = vmatprep.subr.mxu1 %v531_v1  ;;  %723 = vmatprep.subr.mxu0 %v577_v29  ;;  %v555_v1 = vld [vmem:[%s2737_s5 + $0x168] sm:$0xff]  ;;  %v550_v7 = vld [vmem:[%s2737_s5 + $0x140] sm:$0xff]  ;;  %v548_v9 = vld [vmem:[%s2737_s5 + $0x130] sm:$0xff] }
  0x37   : > { %617 = vmatpush1.msra.mxu1 %v530_v3  ;;  %724 = vmatpush1.msra.mxu0 %v576_v33  ;;  %v553_v3 = vld [vmem:[%s2737_s5 + $0x158] sm:$0xff]  ;;  %v546_v11 = vld [vmem:[%s2737_s5 + $0x120] sm:$0xff]  ;;  %v544_v13 = vld [vmem:[%s2737_s5 + $0x110] sm:$0xff] }
  0x38   : > { %618 = vmatprep.subr.mxu1 %v529_v6  ;;  %493 = vmatmul.mubr.f32.gmra.mxu1 %v372_v31  ;;  %v551_v6 = vld [vmem:[%s2737_s5 + $0x148] sm:$0xff]  ;;  %v542_v15 = vld [vmem:[%s2737_s5 + $0x100] sm:$0xff]  ;;  %v505_v19 = vld [vmem:[%s2404_s19 + $0x38] sm:$0xff] }
  0x39   : > { %619 = vmatpush1.msra.mxu1 %v528_v8  ;;  %725 = vmatprep.subr.mxu0 %v575_v35  ;;  %v549_v8 = vld [vmem:[%s2737_s5 + $0x138] sm:$0xff]  ;;  %v502_v17 = vld [vmem:[%s2404_s19 + $0x20] sm:$0xff]  ;;  %v508_v21 = vld [vmem:[%s2404_s19 + $0x50] sm:$0xff] }
  0x3a   : > { %620 = vmatprep.subr.mxu1 %v527_v10  ;;  %726 = vmatpush1.msra.mxu0 %v574_v37  ;;  %v547_v10 = vld [vmem:[%s2737_s5 + $0x128] sm:$0xff] }
  0x3b   : > { %621 = vmatpush1.msra.mxu1 %v526_v12  ;;  %760 = vmatmul.mubr.f32.vlgmr.msra.gmra.mxu0 %v500_v39  ;;  %v545_v12 = vld [vmem:[%s2737_s5 + $0x118] sm:$0xff] }
  0x3c   : > { %622 = vmatprep.subr.mxu1 %v525_v14  ;;  %670 = vmatprep.mubr.f32.mxu1 %v499_v41  ;;  %v543_v14 = vld [vmem:[%s2737_s5 + $0x108] sm:$0xff] }
  0x3d   : > { %623 = vmatpush1.msra.mxu1 %v524_v16  ;;  %765 = vmatprep.mubr.f32.mxu0 %v2063_v4  ;;  %v498_v16 = vld [vmem:[%s2404_s19] sm:$0xff] }
  0x3e   : > { %624 = vmatprep.subr.mxu1 %v523_v18  ;;  %v501_v18 = vld [vmem:[%s2404_s19 + $0x18] sm:$0xff] }
  0x3f   : > { %625 = vmatpush1.msra.mxu1 %v522_v20  ;;  %766 = vmatmul.mubr.f32.gmra.mxu0 %v503_v45  ;;  %v504_v20 = vld [vmem:[%s2404_s19 + $0x30] sm:$0xff]  ;;  %v784_v45 = vld [vmem:[%s2734_s2] sm:$0xff] }
  0x40   : > { %626 = vmatprep.subr.mxu1 %v521_v22  ;;  %771 = vmatprep.mubr.f32.mxu0 %v2063_v4  ;;  %v507_v22 = vld [vmem:[%s2404_s19 + $0x48] sm:$0xff] }
  0x41   : > { %627 = vmatpush1.msra.mxu1 %v520_v24 }
  0x42   : > { %628 = vmatprep.subr.mxu1 %v519_v26 }
  0x43   : > { %629 = vmatpush1.msra.mxu1 %v518_v28  ;;  %772 = vmatmul.mubr.f32.gmra.mxu0 %v506_v50 }
  0x44   : > { %630 = vmatprep.subr.mxu1 %v517_v30  ;;  %777 = vmatprep.mubr.f32.mxu0 %v2063_v4 }
  0x45   : > { %631 = vmatpush1.msra.mxu1 %v516_v32 }
  0x46   : > { %632 = vmatprep.subr.mxu1 %v515_v34 }
  0x47   : > { %633 = vmatpush1.msra.mxu1 %v514_v36  ;;  %778 = vmatmul.mubr.f32.gmra.mxu0 %v509_v55 }
  0x48   : > { %634 = vmatprep.subr.mxu1 %v513_v38  ;;  %855 = vmatprep.mubr.f32.mxu0 %v2063_v4 }
  0x49   : > { %635 = vmatpush1.msra.mxu1 %v512_v40 }
  0x4a   : > { %636 = vmatprep.subr.mxu1 %v511_v42 }
  0x4b   : > { %637 = vmatpush1.msra.mxu1 %v510_v43 }
  0x4c   : > { %638 = vmatprep.subr.mxu1 %v573_v44 }
  0x4d   : > { %639 = vmatpush2.msra.mxu1 %v572_v46 }
  0x4e   : > { %640 = vmatprep.subr.mxu1 %v571_v47 }
  0x4f   : > { %641 = vmatpush2.msra.mxu1 %v570_v48 }
  0x50   : > { %642 = vmatprep.subr.mxu1 %v569_v49 }
  0x51   : > { %643 = vmatpush2.msra.mxu1 %v568_v51 }
  0x52   : > { %644 = vmatprep.subr.mxu1 %v567_v52 }
  0x53   : > { %645 = vmatpush2.msra.mxu1 %v566_v53 }
  0x54   : > { %646 = vmatprep.subr.mxu1 %v565_v54 }
  0x55   : > { %647 = vmatpush2.msra.mxu1 %v564_v56 }
  0x56   : > { %648 = vmatprep.subr.mxu1 %v563_v57 }
  0x57   : > { %649 = vmatpush2.msra.mxu1 %v562_v58 }
  0x58   : > { %650 = vmatprep.subr.mxu1 %v561_v59 }
  0x59   : > { %651 = vmatpush2.msra.mxu1 %v560_v60  ;;  %v785_v60 = vld [vmem:[%s2738_s6] sm:$0xff] }
  0x5a   : > { %652 = vmatprep.subr.mxu1 %v559_v61 }
  0x5b   : > { %653 = vmatpush2.msra.mxu1 %v558_v62  ;;  %v1915_v62 = vld [vmem:[%s2736_s4] ss:$0 sm:$0xff] }
  0x5c   : > { %654 = vmatprep.subr.mxu1 %v557_v63 }
  0x5d   : > { %655 = vmatpush2.msra.mxu1 %v556_v0 }
  0x5e   : > { %656 = vmatprep.subr.mxu1 %v555_v1 }
  0x5f   : > { %657 = vmatpush2.msra.mxu1 %v554_v2 }
  0x60   : > { %658 = vmatprep.subr.mxu1 %v553_v3 }
  0x61   : > { %659 = vmatpush2.msra.mxu1 %v552_v5 }
  0x62   : > { %660 = vmatprep.subr.mxu1 %v551_v6 }
  0x63   : > { %661 = vmatpush2.msra.mxu1 %v550_v7 }
  0x64   : > { %662 = vmatprep.subr.mxu1 %v549_v8 }
  0x65   : > { %663 = vmatpush2.msra.mxu1 %v548_v9  ;;  %v2584_v9 = vld [vmem:[%s2738_s6 + $0x8] sm:$0xff] }
  0x66   : > { %664 = vmatprep.subr.mxu1 %v547_v10 }
  0x67   : > { %665 = vmatpush2.msra.mxu1 %v546_v11 }
  0x68   : > { %666 = vmatprep.subr.mxu1 %v545_v12 }
  0x69   : > { %667 = vmatpush2.msra.mxu1 %v544_v13 }
  0x6a   : > { %668 = vmatprep.subr.mxu1 %v543_v14 }
  0x6b   : > { %669 = vmatpush2.msra.mxu1 %v542_v15 }
  0x6c   : > { %671 = vmatmul.mubr.f32.vlgmr.msra.gmra.mxu1 %v498_v16  ;;  %1993 = vmatprep.subr.mxu1 %v2063_v4 }
  0x6d   : > { %676 = vmatprep.mubr.f32.mxu1 %v502_v17 }
  0x70   : > { %677 = vmatmul.mubr.f32.gmra.mxu1 %v501_v18 }
  0x71   : > { %682 = vmatprep.mubr.f32.mxu1 %v505_v19 }
  0x74   : > { %683 = vmatmul.mubr.f32.gmra.mxu1 %v504_v20 }
  0x75   : > { %688 = vmatprep.mubr.f32.mxu1 %v508_v21 }
  0x78   : > { %689 = vmatmul.mubr.f32.gmra.mxu1 %v507_v22 }
  0x79   : > { %1995 = vmatprep.mubr.msk.f32.mxu1 %vm2064_vm1, %v2063_v4 }
  0xec   : > { %v1960_v23 = vpop.f32.mrf.mxu1 }
  0xee   : > { %v1961_v24 = vpop.f32.mrf.mxu1 }
  0xef   : > { %v1962_v25 = vadd.f32 %v1961_v24, %v1960_v23 }
  0xf0   : > { %v1963_v26 = vpop.f32.mrf.mxu1 }
  0xf1   : > { %v480_v1 = vadd.f32 %v1962_v25, %v1915_v62 }
  0xf2   : > { %v1964_v27 = vpop.f32.mrf.mxu1 }
  0xf3   : > { %v2549_v28 = vadd.f32 %v1964_v27, %v1963_v26 }
  0xf4   : > { %v1966_v29 = vpop.f32.mrf.mxu1 }
  0xf5   : > { %v485_v6 = vadd.f32 %v2549_v28, %v1915_v62 }
  0xf6   : > { %v1967_v30 = vpop.f32.mrf.mxu1 }
  0xf7   : > { %v2551_v31 = vadd.f32 %v1967_v30, %v1966_v29 }
  0xf8   : > { %v1969_v32 = vpop.f32.mrf.mxu1 }
  0xf9   : > { %v490_v12 = vadd.f32 %v2551_v31, %v1915_v62 }
  0xfa   : > { %v1970_v33 = vpop.f32.mrf.mxu1 }
  0xfb   : > { %v2553_v34 = vadd.f32 %v1970_v33, %v1969_v32  ;;  %v761_v35 = vpop.f32.mrf.mxu0 }
  0xfd   : > { %v763_v36 = vpop.f32.mrf.mxu0  ;;  %v495_v16 = vadd.f32 %v2553_v34, %v1915_v62 }
  0xff   : > { %v767_v37 = vpop.f32.mrf.mxu0 }
 0x101   : > { %v769_v38 = vpop.f32.mrf.mxu0 }
 0x103   : > { %v773_v41 = vpop.f32.mrf.mxu0 }
 0x105   : > { %v775_v47 = vpop.f32.mrf.mxu0 }
 0x107   : > { %v779_v52 = vpop.f32.mrf.mxu0 }
 0x109   : > { %v781_v57 = vpop.f32.mrf.mxu0 }
 0x12c   : > { %v672_v39 = vpop.f32.mrf.mxu1 }
 0x12d   : > { %v762_v43 = vadd.f32 %v761_v35, %v672_v39 }
 0x12e   : > { %v674_v40 = vpop.f32.mrf.mxu1 }
 0x12f   : > { %v764_v42 = vadd.f32 %v763_v36, %v674_v40 }
 0x130   : > { %v678_v44 = vpop.f32.mrf.mxu1 }
 0x131   : > { %821 = vmatprep.subr.mxu0 %v764_v42  ;;  %v768_v49 = vadd.f32 %v767_v37, %v678_v44 }
 0x132   : > { %v680_v46 = vpop.f32.mrf.mxu1  ;;  %822 = vmatpush1.msra.mxu0 %v762_v43 }
 0x133   : > { %v770_v48 = vadd.f32 %v769_v38, %v680_v46  ;;  %1916 = vmatmul.mubr.msk.f32.vlgmr.msra.gmra.mxu0 %vm787_vm0, %v784_v45 }
 0x134   : > { %v684_v50 = vpop.f32.mrf.mxu1  ;;  %926 = vmatprep.mubr.f32.mxu0 %v2063_v4 }
 0x135   : > { %892 = vmatprep.subr.mxu0 %v770_v48  ;;  %v774_v54 = vadd.f32 %v773_v41, %v684_v50 }
 0x136   : > { %v686_v51 = vpop.f32.mrf.mxu1  ;;  %893 = vmatpush1.msra.mxu0 %v768_v49 }
 0x137   : > { %v776_v53 = vadd.f32 %v775_v47, %v686_v51  ;;  %1917 = vmatmul.mubr.msk.f32.vlgmr.msra.gmra.mxu0 %vm787_vm0, %v784_v45 }
 0x138   : > { %v690_v55 = vpop.f32.mrf.mxu1  ;;  %997 = vmatprep.mubr.f32.mxu0 %v2063_v4 }
 0x139   : > { %963 = vmatprep.subr.mxu0 %v776_v53  ;;  %v780_v59 = vadd.f32 %v779_v52, %v690_v55 }
 0x13a   : > { %v692_v56 = vpop.f32.mrf.mxu1  ;;  %964 = vmatpush1.msra.mxu0 %v774_v54 }
 0x13b   : > { %v782_v58 = vadd.f32 %v781_v57, %v692_v56  ;;  %1918 = vmatmul.mubr.msk.f32.vlgmr.msra.gmra.mxu0 %vm787_vm0, %v784_v45  ;;  %v1722_v57 = vld [vmem:[%s2739_s7 + $0xf8] sm:$0xff] }
 0x13c   : > { %1068 = vmatprep.mubr.f32.mxu0 %v2063_v4 }
 0x13d   : > { %1034 = vmatprep.subr.mxu0 %v782_v58 }
 0x13e   : > { %1035 = vmatpush1.msra.mxu0 %v780_v59 }
 0x13f   : > { %1919 = vmatmul.mubr.msk.f32.vlgmr.msra.gmra.mxu0 %vm787_vm0, %v784_v45  ;;  %1988 = vmatprep.subr.mxu0 %v2063_v4 }
 0x140   : > { %1990 = vmatprep.mubr.msk.f32.mxu0 %vm2064_vm1, %v2063_v4 }
 0x1f3   : > { %v857_v61 = vpop.f32.mrf.mxu0 }
 0x1f4   : > { %v858_v63 = vadd.f32 %v857_v61, %v785_v60 }
 0x1f5   : > { %v859_v0 = vpop.f32.mrf.mxu0 }
 0x1f6   : > { %1989 = vmatpush3.xpose.msra.mxu0 %v858_v63  ;;  %v860_v14 = vadd.f32 %v859_v0, %v2584_v9  ;;  %v1721_v63 = vld [vmem:[%s2739_s7 + $0xf0] sm:$0xff]  ;;  %v1720_v0 = vld [vmem:[%s2739_s7 + $0xe8] sm:$0xff] }
 0x1f7   : > { %v928_v2 = vpop.f32.mrf.mxu0  ;;  %1998 = vmatprep.subr.mxu0 %v2063_v4 }
 0x1f8   : > { %v929_v3 = vadd.f32 %v928_v2, %v785_v60 }
 0x1f9   : > { %v930_v5 = vpop.f32.mrf.mxu0  ;;  %1991 = vmatmul.mubr.f32.vlgmr.msra.gmra.mxu0 %v480_v1  ;;  %v1719_v1 = vld [vmem:[%s2739_s7 + $0xe0] sm:$0xff] }
 0x1fa   : > { %1994 = vmatpush3.xpose.msra.mxu1 %v929_v3  ;;  %2000 = vmatprep.mubr.msk.f32.mxu0 %vm2064_vm1, %v2063_v4  ;;  %v931_v17 = vadd.f32 %v930_v5, %v2584_v9  ;;  %v1718_v3 = vld [vmem:[%s2739_s7 + $0xd8] sm:$0xff] }
 0x1fb   : > { %v999_v7 = vpop.f32.mrf.mxu0  ;;  %2003 = vmatprep.subr.mxu1 %v2063_v4 }
 0x1fc   : > { %v1000_v8 = vadd.f32 %v999_v7, %v785_v60  ;;  %v1716_v7 = vld [vmem:[%s2739_s7 + $0xc8] sm:$0xff] }
 0x1fd   : > { %v1001_v10 = vpop.f32.mrf.mxu0  ;;  %1996 = vmatmul.mubr.f32.vlgmr.msra.gmra.mxu1 %v485_v6  ;;  %v1717_v6 = vld [vmem:[%s2739_s7 + $0xd0] sm:$0xff] }
 0x1fe   : > { %v2587_v11 = vadd.f32 %v1001_v10, %v2584_v9  ;;  %1999 = vmatpush3.xpose.msra.mxu0 %v1000_v8  ;;  %2005 = vmatprep.mubr.msk.f32.mxu1 %vm2064_vm1, %v2063_v4  ;;  %v1715_v8 = vld [vmem:[%s2739_s7 + $0xc0] sm:$0xff]  ;;  %v1713_v10 = vld [vmem:[%s2739_s7 + $0xb0] sm:$0xff] }
 0x1ff   : > { %v1070_v13 = vpop.f32.mrf.mxu0  ;;  %2008 = vmatprep.subr.mxu0 %v2063_v4 }
 0x200   : > { %v1071_v15 = vadd.f32 %v1070_v13, %v785_v60  ;;  %v1710_v13 = vld [vmem:[%s2739_s7 + $0x98] sm:$0xff] }
 0x201   : > { %2001 = vmatmul.mubr.f32.vlgmr.msra.gmra.mxu0 %v490_v12  ;;  %v1072_v18 = vpop.f32.mrf.mxu0  ;;  %v1711_v12 = vld [vmem:[%s2739_s7 + $0xa0] sm:$0xff] }
 0x202   : > { %2004 = vmatpush3.xpose.msra.mxu1 %v1071_v15  ;;  %2009 = vmatpush3.msra.mxu0 %v860_v14  ;;  %v1073_v60 = vadd.f32 %v1072_v18, %v2584_v9  ;;  %v1714_v9 = vld [vmem:[%s2739_s7 + $0xb8] sm:$0xff]  ;;  %v1709_v14 = vld [vmem:[%s2739_s7 + $0x90] sm:$0xff]  ;;  %v1708_v15 = vld [vmem:[%s2739_s7 + $0x88] sm:$0xff] }
 0x203   : > { %2013 = vmatprep.subr.mxu1 %v2063_v4  ;;  %2010 = vmatprep.mubr.msk.f32.mxu0 %vm2064_vm1, %v2063_v4  ;;  %v1705_v18 = vld [vmem:[%s2739_s7 + $0x70] sm:$0xff] }
 0x204   : > { %2018 = vmatprep.subr.mxu0 %v2063_v4 }
 0x205   : > { %2006 = vmatmul.mubr.f32.vlgmr.msra.gmra.mxu1 %v495_v16  ;;  %v1707_v16 = vld [vmem:[%s2739_s7 + $0x80] sm:$0xff] }
 0x206   : > { %2014 = vmatpush3.msra.mxu1 %v931_v17  ;;  %2015 = vmatprep.mubr.msk.f32.mxu1 %vm2064_vm1, %v2063_v4  ;;  %v1706_v17 = vld [vmem:[%s2739_s7 + $0x78] sm:$0xff] }
 0x207   : > { %2023 = vmatprep.subr.mxu1 %v2063_v4 }
 0x2b9   : > { %v1141_v19 = vpop.f32.mrf.mxu0 }
 0x2ba   : > { %v1355_v20 = vsel %vm787_vm0, %v1141_v19, -inf }
 0x2bb   : > { %1356 = vmax.xlane.f32.xlu0 %v1355_v20  ;;  %v1992_v21 = vpop.f32.mrf.mxu0  ;;  %v1703_v20 = vld [vmem:[%s2739_s7 + $0x60] sm:$0xff] }
 0x2bc   : > { %v1702_v21 = vld [vmem:[%s2739_s7 + $0x58] sm:$0xff] }
 0x2bd   : > { %v1211_v22 = vpop.f32.mrf.mxu1 }
 0x2be   : > { %v1358_v23 = vsel %vm787_vm0, %v1211_v22, -inf }
 0x2bf   : > { %v1997_v24 = vpop.f32.mrf.mxu1  ;;  %1359 = vmax.xlane.f32.xlu0 %v1358_v23  ;;  %v1700_v23 = vld [vmem:[%s2739_s7 + $0x48] sm:$0xff] }
 0x2c0   : > { %v1699_v24 = vld [vmem:[%s2739_s7 + $0x40] sm:$0xff] }
 0x2c1   : > { %v1281_v25 = vpop.f32.mrf.mxu0 }
 0x2c2   : > { %v1361_v26 = vsel %vm787_vm0, %v1281_v25, -inf }
 0x2c3   : > { %1362 = vmax.xlane.f32.xlu1 %v1361_v26  ;;  %v2002_v27 = vpop.f32.mrf.mxu0  ;;  %v1697_v26 = vld [vmem:[%s2739_s7 + $0x30] sm:$0xff] }
 0x2c4   : > { %v1696_v27 = vld [vmem:[%s2739_s7 + $0x28] sm:$0xff] }
 0x2c5   : > { %v1351_v28 = vpop.f32.mrf.mxu1 }
 0x2c6   : > { %v1364_v29 = vsel %vm787_vm0, %v1351_v28, -inf }
 0x2c7   : > { %v2007_v30 = vpop.f32.mrf.mxu1  ;;  %1365 = vmax.xlane.f32.xlu1 %v1364_v29  ;;  %v1694_v29 = vld [vmem:[%s2739_s7 + $0x18] sm:$0xff] }
 0x2c8   : > { %v1693_v30 = vld [vmem:[%s2739_s7 + $0x10] sm:$0xff] }
 0x344   : > { %v1357_v31 = vpop.xlane.xlu0 %1356 }
 0x345   : > { %v1367_v32 = vsub.f32 %v1141_v19, %v1357_v31  ;;  %v1704_v19 = vld [vmem:[%s2739_s7 + $0x68] sm:$0xff] }
 0x346   : > { %v1692_v31 = vld [vmem:[%s2739_s7 + $0x8] sm:$0xff] }
 0x347   : > { %v1371_v33 = vmul.f32 1.442695, %v1367_v32  ;;  %v1691_v32 = vld [vmem:[%s2739_s7] sm:$0xff] }
 0x348   : > { %v1360_v34 = vpop.xlane.xlu0 %1359 }
 0x349   : > { %2039 = vpow2.f32 %v1371_v33  ;;  %v1368_v35 = vsub.f32 %v1211_v22, %v1360_v34  ;;  %v1701_v22 = vld [vmem:[%s2739_s7 + $0x50] sm:$0xff] }
 0x34b   : > { %v1373_v36 = vmul.f32 1.442695, %v1368_v35 }
 0x34c   : > { %v1363_v37 = vpop.xlane.xlu1 %1362 }
 0x34d   : > { %2041 = vpow2.f32 %v1373_v36  ;;  %v1369_v38 = vsub.f32 %v1281_v25, %v1363_v37  ;;  %v1698_v25 = vld [vmem:[%s2739_s7 + $0x38] sm:$0xff] }
 0x34f   : > { %v1375_v39 = vmul.f32 1.442695, %v1369_v38 }
 0x350   : > { %v1366_v40 = vpop.xlane.xlu1 %1365 }
 0x351   : > { %2043 = vpow2.f32 %v1375_v39  ;;  %v1370_v41 = vsub.f32 %v1351_v28, %v1366_v40  ;;  %v1695_v28 = vld [vmem:[%s2739_s7 + $0x20] sm:$0xff] }
 0x353   : > { %v1377_v42 = vmul.f32 1.442695, %v1370_v41  ;;  %v1725_v41 = vlaneseq }
 0x355   : > { %2045 = vpow2.f32 %v1377_v42  ;;  %v1726_v42 = vshrl.u32 %v1725_v41, 7 }
 0x356   : > { %v2040_v43 = vpop.eup %2039 }
 0x357   : > { %v1379_v44 = vsel %vm787_vm0, %v2040_v43, 0.0 }
 0x358   : > { %1380 = vadd.xlane.f32.xlu0 %v1379_v44  ;;  %v1723_v44 = vld [vmem:[%s2740_s8] sm:$0x3] }
 0x35a   : > { %v2042_v45 = vpop.eup %2041 }
 0x35b   : > { %v1382_v46 = vsel %vm787_vm0, %v2042_v45, 0.0 }
 0x35c   : > { %1383 = vadd.xlane.f32.xlu1 %v1382_v46 }
 0x35e   : > { %v2044_v47 = vpop.eup %2043 }
 0x35f   : > { %v1385_v48 = vsel %vm787_vm0, %v2044_v47, 0.0 }
 0x360   : > { %1386 = vadd.xlane.f32.xlu0 %v1385_v48 }
 0x362   : > { %v2046_v49 = vpop.eup %2045 }
 0x363   : > { %v1388_v50 = vsel %vm787_vm0, %v2046_v49, 0.0 }
 0x364   : > { %1389 = vadd.xlane.f32.xlu1 %v1388_v50 }
 0x3e1   : > { %v1381_v51 = vpop.xlane.xlu0 %1380 }
 0x3e2   : > { %2047 = vrcp.f32 %v1381_v51 }
 0x3e5   : > { %v1384_v52 = vpop.xlane.xlu1 %1383 }
 0x3e6   : > { %2049 = vrcp.f32 %v1384_v52 }
 0x3e9   : > { %v1387_v53 = vpop.xlane.xlu0 %1386 }
 0x3ea   : > { %2051 = vrcp.f32 %v1387_v53 }
 0x3ed   : > { %v1390_v54 = vpop.xlane.xlu1 %1389 }
 0x3ee   : > { %2053 = vrcp.f32 %v1390_v54 }
 0x3ef   : > { %v2048_v55 = vpop.eup %2047 }
 0x3f0   : > { %v1395_v56 = vmul.f32 %v2048_v55, %v2040_v43  ;;  %v1727_v43 = vsub.s32 0, %v1726_v42 }
 0x3f2   : > { %2011 = vmatmul.mubr.msk.f32.vlgmr.msra.gmra.mxu0 %vm787_vm0, %v1395_v56  ;;  %v1728_v46 = vrot.slane %v1723_v44, %v1727_v43 }
 0x3f3   : > { %v2050_v58 = vpop.eup %2049  ;;  %2019 = vmatpush3.msra.mxu0 %v2587_v11  ;;  %2020 = vmatprep.mubr.msk.f32.mxu0 %vm2064_vm1, %v2063_v4  ;;  %v1712_v11 = vld [vmem:[%s2739_s7 + $0xa8] sm:$0xff] }
 0x3f4   : > { %v1396_v59 = vmul.f32 %v2050_v58, %v2042_v45  ;;  %1735 = vmatprep.subr.mxu0 %v1722_v57  ;;  %v1731_v45 = vsub.s32 1, %v1726_v42 }
 0x3f6   : > { %2016 = vmatmul.mubr.msk.f32.vlgmr.msra.gmra.mxu1 %vm787_vm0, %v1396_v59 }
 0x3f7   : > { %v2052_v61 = vpop.eup %2051  ;;  %2024 = vmatpush3.msra.mxu1 %v1073_v60  ;;  %2025 = vmatprep.mubr.msk.f32.mxu1 %vm2064_vm1, %v2063_v4 }
 0x3f8   : > { %v1397_v62 = vmul.f32 %v2052_v61, %v2044_v47  ;;  %v1732_v47 = vrot.slane %v1723_v44, %v1731_v45 }
 0x3fa   : > { %2021 = vmatmul.mubr.msk.f32.vlgmr.msra.gmra.mxu0 %vm787_vm0, %v1397_v62 }
 0x3fb   : > { %v2054_v2 = vpop.eup %2053  ;;  %1736 = vmatpush1.msra.mxu0 %v1721_v63  ;;  %1799 = vmatprep.mubr.f32.mxu0 %v2063_v4 }
 0x3fc   : > { %v1398_v5 = vmul.f32 %v2054_v2, %v2046_v49  ;;  %1737 = vmatprep.subr.mxu0 %v1720_v0 }
 0x3fd   : > { %1738 = vmatpush1.msra.mxu0 %v1719_v1 }
 0x3fe   : > { %2026 = vmatmul.mubr.msk.f32.vlgmr.msra.gmra.mxu1 %vm787_vm0, %v1398_v5  ;;  %1739 = vmatprep.subr.mxu0 %v1718_v3 }
 0x3ff   : > { %1740 = vmatpush1.msra.mxu0 %v1717_v6 }
 0x400   : > { %1741 = vmatprep.subr.mxu0 %v1716_v7 }
 0x401   : > { %1742 = vmatpush1.msra.mxu0 %v1715_v8 }
 0x402   : > { %1743 = vmatprep.subr.mxu0 %v1714_v9 }
 0x403   : > { %1744 = vmatpush1.msra.mxu0 %v1713_v10 }
 0x404   : > { %1745 = vmatprep.subr.mxu0 %v1712_v11 }
 0x405   : > { %1746 = vmatpush1.msra.mxu0 %v1711_v12 }
 0x406   : > { %1747 = vmatprep.subr.mxu0 %v1710_v13 }
 0x407   : > { %1748 = vmatpush1.msra.mxu0 %v1709_v14 }
 0x408   : > { %1749 = vmatprep.subr.mxu0 %v1708_v15 }
 0x409   : > { %1750 = vmatpush1.msra.mxu0 %v1707_v16 }
 0x40a   : > { %1751 = vmatprep.subr.mxu0 %v1706_v17 }
 0x40b   : > { %1752 = vmatpush1.msra.mxu0 %v1705_v18 }
 0x40c   : > { %1753 = vmatprep.subr.mxu0 %v1704_v19 }
 0x40d   : > { %1754 = vmatpush1.msra.mxu0 %v1703_v20 }
 0x40e   : > { %1755 = vmatprep.subr.mxu0 %v1702_v21 }
 0x40f   : > { %1756 = vmatpush1.msra.mxu0 %v1701_v22 }
 0x410   : > { %1757 = vmatprep.subr.mxu0 %v1700_v23 }
 0x411   : > { %1758 = vmatpush1.msra.mxu0 %v1699_v24 }
 0x412   : > { %1759 = vmatprep.subr.mxu0 %v1698_v25 }
 0x413   : > { %1760 = vmatpush1.msra.mxu0 %v1697_v26 }
 0x414   : > { %1761 = vmatprep.subr.mxu0 %v1696_v27 }
 0x415   : > { %1762 = vmatpush1.msra.mxu0 %v1695_v28 }
 0x416   : > { %1763 = vmatprep.subr.mxu0 %v1694_v29 }
 0x417   : > { %1764 = vmatpush1.msra.mxu0 %v1693_v30 }
 0x418   : > { %1765 = vmatprep.subr.mxu0 %v1692_v31 }
 0x419   : > { %1766 = vmatpush1.msra.mxu0 %v1691_v32 }
 0x4b2   : > { %v1468_v33 = vpop.f32.mrf.mxu0 }
 0x4b3   : > { %1800 = vmatmul.mubr.f32.vlgmr.msra.gmra.mxu0 %v1468_v33 }
 0x4b4   : > { %v2012_v34 = vpop.f32.mrf.mxu0  ;;  %1805 = vmatprep.mubr.f32.mxu0 %v2063_v4 }
 0x4b6   : > { %v1541_v35 = vpop.f32.mrf.mxu1 }
 0x4b7   : > { %1806 = vmatmul.mubr.f32.gmra.mxu0 %v1541_v35 }
 0x4b8   : > { %v2017_v36 = vpop.f32.mrf.mxu1  ;;  %1811 = vmatprep.mubr.f32.mxu0 %v2063_v4 }
 0x4ba   : > { %v1614_v37 = vpop.f32.mrf.mxu0 }
 0x4bb   : > { %1812 = vmatmul.mubr.f32.gmra.mxu0 %v1614_v37 }
 0x4bc   : > { %v2022_v38 = vpop.f32.mrf.mxu0  ;;  %1817 = vmatprep.mubr.f32.mxu0 %v2063_v4 }
 0x4be   : > { %v1687_v39 = vpop.f32.mrf.mxu1 }
 0x4bf   : > { %1818 = vmatmul.mubr.f32.gmra.mxu0 %v1687_v39 }
 0x4c0   : > { %v2027_v40 = vpop.f32.mrf.mxu1 }
 0x573   : > { %v1801_v48 = vpop.f32.mrf.mxu0 }
 0x574   : > { %v1802_v4 = vadd.f32 %v1801_v48, %v1728_v46 }
 0x575   : > { %v1803_v49 = vpop.f32.mrf.mxu0 }
 0x576   : > { %1824 = vst [vmem:[%s364_s23] sm:$0xff] %v1802_v4  ;;  %v1804_v50 = vadd.f32 %v1803_v49, %v1732_v47 }
 0x577   : > { %v1807_v51 = vpop.f32.mrf.mxu0 }
 0x578   : > { %1825 = vst [vmem:[%s364_s23 + $0x8] sm:$0xff] %v1804_v50  ;;  %v1808_v52 = vadd.f32 %v1807_v51, %v1728_v46 }
 0x579   : > { %v1809_v53 = vpop.f32.mrf.mxu0 }
 0x57a   : > { %1826 = vst [vmem:[%s364_s23 + $0x10] sm:$0xff] %v1808_v52  ;;  %v1810_v54 = vadd.f32 %v1809_v53, %v1732_v47 }
 0x57b   : > { %v1813_v55 = vpop.f32.mrf.mxu0 }
 0x57c   : > { %1827 = vst [vmem:[%s364_s23 + $0x18] sm:$0xff] %v1810_v54  ;;  %v1814_v56 = vadd.f32 %v1813_v55, %v1728_v46 }
 0x57d   : > { %v1815_v57 = vpop.f32.mrf.mxu0 }
 0x57e   : > { %1828 = vst [vmem:[%s364_s23 + $0x20] sm:$0xff] %v1814_v56  ;;  %v1816_v58 = vadd.f32 %v1815_v57, %v1732_v47 }
 0x57f   : > { %v1819_v59 = vpop.f32.mrf.mxu0 }
 0x580   : > { %1829 = vst [vmem:[%s364_s23 + $0x28] sm:$0xff] %v1816_v58  ;;  %v1820_v60 = vadd.f32 %v1819_v59, %v1728_v46 }
 0x581   : > { %v1821_v61 = vpop.f32.mrf.mxu0 }
 0x582   : > { %1830 = vst [vmem:[%s364_s23 + $0x30] sm:$0xff] %v1820_v60  ;;  %v1822_v62 = vadd.f32 %v1821_v61, %v1732_v47 }
 0x584   : > { %1831 = vst [vmem:[%s364_s23 + $0x38] sm:$0xff] %v1822_v62 }
 0x585 PF: > { %s19_s30 = sadd.s32 1, %s2061_s30  }
 0x586   : > { %p16_p4 = scmp.ge.s32.totalorder %s19_s30, 4  }
 0x588   :  { %18 = sbr.rel (!%p16_p4) target bundleno = 1 (0x1), region = 89 }

</bundles_post_ra>
